<compile_context>
chip_gen: v6e
topology: v6e:2x2x1
jax: 0.10.0
libtpu: 0.0.40
codegen_flags: <defaults>
</compile_context>

<pallas_src>
import jax
import jax.numpy as jnp
import numpy as np
from jax.experimental import pallas as pl
from jax.experimental.pallas import tpu as pltpu


# ---------------------------------------------------------------------------
# helpers
# ---------------------------------------------------------------------------

def _round_up(x, m):
    return ((x + m - 1) // m) * m


def _vmem_plan():
    """(tile-sizing budget, Mosaic vmem_limit_bytes), generation-dependent."""
    cap = 64 << 20  # conservative v7x assumption if the query fails
    try:
        info = pltpu.get_tpu_info()
        cap_attr = getattr(info, "vmem_capacity_bytes", None)
        if cap_attr:
            cap = int(cap_attr)
    except Exception:
        pass
    budget = int(cap * 0.55)                  # ~70 MiB on v5e/v6e, ~35 MiB on v7x
    limit = max(min(int(cap * 0.75), 112 << 20), 32 << 20)
    return budget, limit


def _choose_tiling(n, r_rels, d_pad, budget, force_mode=None):
    """Pick aggregation tiling. mode='resident': MSG fully VMEM-resident.
    mode='stream': src(contraction)-tiled streaming for large graphs."""
    cands = (2048, 1024, 512, 256, 128, 64, 32)   # multiples of 32 (int8 sublane)
    n128 = _round_up(max(n, 1), 128)
    slack = 2 << 20

    best_res = None
    if force_mode != "stream":
        for tv in cands:
            n_pad = _round_up(n, max(tv, 128))
            if tv > n_pad:
                continue
            # keep >=2 dst tiles for megacore whenever possible
            if n_pad // tv < 2 and tv > 32:
                continue
            use = (2 * (r_rels + 1) * n_pad * d_pad * 2   # resident MSG (bf16, 2 bufs)
                   + 2 * tv * n_pad * 1                   # A tile (int8), double-buffered
                   + 2 * tv * d_pad * 4                   # out accumulator block
                   + d_pad * 4 + slack)
            if use <= budget:
                best_res = dict(mode="resident", tile_v=tv, tile_u=n_pad, n_pad=n_pad)
                break
        if best_res is not None and (best_res["tile_v"] >= 256
                                     or best_res["n_pad"] <= 4096):
            return best_res
        if force_mode == "resident" and best_res is not None:
            return best_res

    # src(contraction)-tiled streaming path
    for tv in cands:
        if tv > max(n128, 128):
            continue
        for tu in (2048, 1024, 512, 256, 128):
            if tu > max(n128, 128):
                continue
            n_pad = _round_up(n, max(tv, tu))
            if n_pad // tv < 2 and tv > 32:
                continue
            use = (2 * tv * tu * 1            # A tile (int8)
                   + 2 * tu * d_pad * 2       # MSG slab (bf16)
                   + 2 * tv * d_pad * 2       # self-loop chunk (bf16)
                   + 2 * tv * d_pad * 4       # out accumulator
                   + d_pad * 4 + slack)
            if use <= budget:
                return dict(mode="stream", tile_v=tv, tile_u=tu, n_pad=n_pad)
    if best_res is not None:
        return best_res
    return dict(mode="stream", tile_v=32, tile_u=128, n_pad=n128)


# ---------------------------------------------------------------------------
# message GEMM: MSG[r] = X @ W_r   ->  [R+1, N_pad, d_pad] bf16  (W_{R} = W_loop)
# ---------------------------------------------------------------------------

def _msg_kernel(x_ref, w_ref, o_ref):
    x = x_ref[...]
    for rr in range(o_ref.shape[0]):          # static relation loop (R+1 small)
        o_ref[rr] = jnp.dot(x, w_ref[rr],
                            preferred_element_type=jnp.float32).astype(o_ref.dtype)


def _msg_matmul(x_p, w_all):
    n_pad, d_in = x_p.shape
    n_w, _, d_pad = w_all.shape
    tile_row = n_pad
    for t in (1024, 512, 256, 128):
        if n_pad % t == 0:
            tile_row = t
            break
    return pl.pallas_call(
        _msg_kernel,
        out_shape=jax.ShapeDtypeStruct((n_w, n_pad, d_pad), jnp.bfloat16),
        grid_spec=pltpu.PrefetchScalarGridSpec(
            num_scalar_prefetch=0,
            grid=(n_pad // tile_row,),
            in_specs=[
                pl.BlockSpec((tile_row, d_in), lambda i: (i, 0)),
                pl.BlockSpec((n_w, d_in, d_pad), lambda i: (0, 0, 0)),  # W resident
            ],
            out_specs=pl.BlockSpec((n_w, tile_row, d_pad), lambda i: (0, i, 0)),
        ),
        compiler_params=pltpu.CompilerParams(
            dimension_semantics=("parallel",)),
    )(x_p, w_all)


# ---------------------------------------------------------------------------
# aggregation, path 1: MSG fully VMEM-resident
#   h[v_tile] = relu( loop_msg + bias + sum_r A[r, v_tile, :] @ MSG[r] )
# ---------------------------------------------------------------------------

def _aggregate_resident(a_p, msg, bias_p, d_pad, plan, vmem_limit):
    r_rels, n_pad, _ = a_p.shape
    tile_v = plan["tile_v"]
    n_tiles = n_pad // tile_v

    def kernel(a_ref, msg_ref, bias_ref, out_ref):
        v = pl.program_id(0)
        r = pl.program_id(1)

        @pl.when(r == 0)
        def _():
            # init with self-loop message + bias (saves one RMW of the out block)
            row0 = pl.multiple_of(v * tile_v, tile_v)
            loop_view = msg_ref.at[r_rels]                      # self-loop slab
            loop_msg = loop_view[pl.ds(row0, tile_v), :]
            out_ref[...] = loop_msg.astype(jnp.float32) + bias_ref[...]

        # bf16 x bf16 -> f32 on the MXU (A widened from int8 on the VPU)
        out_ref[...] += jnp.dot(a_ref[...].astype(jnp.bfloat16), msg_ref[r],
                                preferred_element_type=jnp.float32)

        @pl.when(r == r_rels - 1)
        def _():
            out_ref[...] = jnp.maximum(out_ref[...], 0.0)

    cost = pl.CostEstimate(
        flops=2 * r_rels * n_pad * n_pad * d_pad + 3 * n_pad * d_pad,
        transcendentals=0,
        bytes_accessed=(r_rels * n_pad * n_pad                 # A (int8)
                        + (r_rels + 1) * n_pad * d_pad * 2     # MSG (resident, once)
                        + n_pad * d_pad * 4))                  # out

    return pl.pallas_call(
        kernel,
        out_shape=jax.ShapeDtypeStruct((n_pad, d_pad), jnp.float32),
        grid_spec=pltpu.PrefetchScalarGridSpec(
            num_scalar_prefetch=0,
            grid=(n_tiles, r_rels),                    # dst tiles parallel, rels last
            in_specs=[
                pl.BlockSpec((pl.Squeezed(), tile_v, n_pad),
                             lambda v, r: (r, v, 0)),                   # A[r, v_tile, :]
                pl.BlockSpec((r_rels + 1, n_pad, d_pad),
                             lambda v, r: (0, 0, 0)),                   # MSG resident
                pl.BlockSpec((1, d_pad), lambda v, r: (0, 0)),          # bias
            ],
            out_specs=pl.BlockSpec((tile_v, d_pad), lambda v, r: (v, 0)),
        ),
        compiler_params=pltpu.CompilerParams(
            dimension_semantics=("parallel", "arbitrary"),
            vmem_limit_bytes=vmem_limit),
        cost_estimate=cost,
    )(a_p, msg, bias_p)


# ---------------------------------------------------------------------------
# aggregation, path 2: src(contraction)-tiled streaming (large graphs / v7x)
# ---------------------------------------------------------------------------

def _aggregate_stream(a_p, msg, bias_p, d_pad, plan, vmem_limit):
    r_rels, n_pad, _ = a_p.shape
    tile_v, tile_u = plan["tile_v"], plan["tile_u"]
    nv, nu = n_pad // tile_v, n_pad // tile_u

    def kernel(a_ref, msg_ref, loop_ref, bias_ref, out_ref):
        r = pl.program_id(1)
        u = pl.program_id(2)

        @pl.when(jnp.logical_and(r == 0, u == 0))
        def _():
            out_ref[...] = loop_ref[...].astype(jnp.float32) + bias_ref[...]

        out_ref[...] += jnp.dot(a_ref[...].astype(jnp.bfloat16), msg_ref[...],
                                preferred_element_type=jnp.float32)

        @pl.when(jnp.logical_and(r == r_rels - 1, u == nu - 1))
        def _():
            out_ref[...] = jnp.maximum(out_ref[...], 0.0)

    cost = pl.CostEstimate(
        flops=2 * r_rels * n_pad * n_pad * d_pad + 3 * n_pad * d_pad,
        transcendentals=0,
        bytes_accessed=(r_rels * n_pad * n_pad
                        + nv * (r_rels + 1) * n_pad * d_pad * 2
                        + n_pad * d_pad * 4))

    return pl.pallas_call(
        kernel,
        out_shape=jax.ShapeDtypeStruct((n_pad, d_pad), jnp.float32),
        grid_spec=pltpu.PrefetchScalarGridSpec(
            num_scalar_prefetch=0,
            grid=(nv, r_rels, nu),
            in_specs=[
                pl.BlockSpec((pl.Squeezed(), tile_v, tile_u),
                             lambda v, r, u: (r, v, u)),                 # A tile
                pl.BlockSpec((pl.Squeezed(), tile_u, d_pad),
                             lambda v, r, u: (r, u, 0)),                 # MSG slab
                pl.BlockSpec((pl.Squeezed(), tile_v, d_pad),
                             lambda v, r, u: (r_rels, v, 0)),            # self-loop chunk
                pl.BlockSpec((1, d_pad), lambda v, r, u: (0, 0)),        # bias
            ],
            out_specs=pl.BlockSpec((tile_v, d_pad), lambda v, r, u: (v, 0)),
        ),
        compiler_params=pltpu.CompilerParams(
            dimension_semantics=("parallel", "arbitrary", "arbitrary"),
            vmem_limit_bytes=vmem_limit),
        cost_estimate=cost,
    )(a_p, msg, msg, bias_p)


# ---------------------------------------------------------------------------
# one RelGraphConv layer (+ fused self-loop / bias / ReLU)
# ---------------------------------------------------------------------------

def rgcn_layer(a_p, x_p, w, loop_w, bias, *, d_pad, plan, vmem_limit):
    r_rels, n_pad, _ = a_p.shape
    d_in_x = x_p.shape[1]
    _, d_in, d_out = w.shape
    assert d_out <= d_pad and d_in <= d_in_x

    # Fold the self-loop weight in as "relation R"; zero-pad to X's width and to a
    # lane-dense 128-wide output. bf16 weights -> bf16 x bf16 message GEMM.
    w_ext = jnp.concatenate([w, loop_w[None]], axis=0)            # [R+1, Din, Dout]
    w_all = jnp.zeros((r_rels + 1, d_in_x, d_pad), jnp.bfloat16)
    w_all = w_all.at[:, :d_in, :d_out].set(w_ext.astype(jnp.bfloat16))
    bias_p = jnp.zeros((1, d_pad), jnp.float32).at[:, :d_out].set(bias)

    msg = _msg_matmul(x_p.astype(jnp.bfloat16), w_all)   # [R+1, N_pad, d_pad] bf16
    if plan["mode"] == "resident":
        return _aggregate_resident(a_p, msg, bias_p, d_pad, plan, vmem_limit)
    return _aggregate_stream(a_p, msg, bias_p, d_pad, plan, vmem_limit)


# ---------------------------------------------------------------------------
# mean_nodes readout: out = M @ H
# ---------------------------------------------------------------------------

def _readout_kernel(m_ref, h_ref, out_ref):
    @pl.when(pl.program_id(0) == 0)
    def _():
        out_ref[...] = jnp.zeros_like(out_ref)
    out_ref[...] += jnp.dot(m_ref[...], h_ref[...],
                            preferred_element_type=jnp.float32)


def mean_readout(m_p, h):
    g_pad, n_pad = m_p.shape
    d_pad = h.shape[1]
    tile_rd = n_pad
    if n_pad > 4096:
        for t in (4096, 2048, 1024, 512, 256, 128):
            if n_pad % t == 0:
                tile_rd = t
                break
    # TODO(synk): readout stays a separate kernel instead of fusing into layer-2's
    # finalize (a shared (G, D) accumulator across the parallel dst-tile axis would
    # race across TensorCores).
    return pl.pallas_call(
        _readout_kernel,
        out_shape=jax.ShapeDtypeStruct((g_pad, d_pad), jnp.float32),
        grid_spec=pltpu.PrefetchScalarGridSpec(
            num_scalar_prefetch=0,
            grid=(n_pad // tile_rd,),
            in_specs=[
                pl.BlockSpec((g_pad, tile_rd), lambda i: (0, i)),
                pl.BlockSpec((tile_rd, d_pad), lambda i: (i, 0)),
            ],
            out_specs=pl.BlockSpec((g_pad, d_pad), lambda i: (0, 0)),
        ),
        compiler_params=pltpu.CompilerParams(
            dimension_semantics=("arbitrary",)),
    )(m_p, h)


# ---------------------------------------------------------------------------
# parameters + full forward
# ---------------------------------------------------------------------------

def init_rel_graph_conv_params(key, in_feats, out_feats, num_rels, num_bases):
    """Deterministic synthetic init mirroring DGL RelGraphConv('basis') shapes."""
    k1, k2, k3, k4 = jax.random.split(key, 4)
    basis = 0.1 * jax.random.normal(k1, (num_bases, in_feats, out_feats), jnp.float32)
    coeff = 0.1 * jax.random.normal(k2, (num_rels, num_bases), jnp.float32)
    loop_w = 0.1 * jax.random.normal(k3, (in_feats, out_feats), jnp.float32)
    bias = 0.05 * jax.random.normal(k4, (1, out_feats), jnp.float32)
    return basis, coeff, loop_w, bias


def rel_graph_conv_n_forward(A, M, X, params1, params2, *, d_pad=128,
                             force_mode=None, vmem_budget_bytes=None):
    R, N, _ = A.shape
    G = M.shape[0]
    num_classes = params2[0].shape[-1]

    budget, vmem_limit = _vmem_plan()
    if vmem_budget_bytes is not None:
        budget = vmem_budget_bytes
    plan = _choose_tiling(N, R, d_pad, budget, force_mode=force_mode)
    n_pad = plan["n_pad"]
    g_pad = _round_up(G, 8)

    # A stored int8 (edge-multiplicity counts <= 127; exact) and widened to bf16
    # in-kernel. Padded src columns of A and padded columns of M are zero, so
    # padded node rows of h (which equal relu(bias), not zero) never leak into
    # real outputs; keep that invariant if fusing the readout later.
    a_p = jnp.zeros((R, n_pad, n_pad), jnp.int8).at[:, :N, :N].set(
        A.astype(jnp.int8))
    x_p = jnp.zeros((n_pad, X.shape[1]), jnp.float32).at[:N, :].set(X)
    m_p = jnp.zeros((g_pad, n_pad), jnp.float32).at[:G, :N].set(M)

    basis1, coeff1, loop1, bias1 = params1
    W1 = jnp.einsum('rb,bio->rio', coeff1, basis1)     # basis combination (glue)
    h = rgcn_layer(a_p, x_p, W1, loop1, bias1, d_pad=d_pad, plan=plan,
                   vmem_limit=vmem_limit)

    basis2, coeff2, loop2, bias2 = params2
    W2 = jnp.einsum('rb,bio->rio', coeff2, basis2)
    h = rgcn_layer(a_p, h, W2, loop2, bias2, d_pad=d_pad, plan=plan,
                   vmem_limit=vmem_limit)

    out = mean_readout(m_p, h)                          # [G_pad, d_pad]
    return out[:G, :num_classes]


# ---------------------------------------------------------------------------
# pure-JAX reference
# ---------------------------------------------------------------------------

def ref_layer(A, X, params):
    basis, coeff, loop_w, bias = params
    W = jnp.einsum('rb,bio->rio', coeff, basis)
    msgs = jnp.einsum('nd,rdo->rno', X, W)
    agg = jnp.einsum('rvu,ruo->vo', A, msgs)
    return jnp.maximum(agg + X @ loop_w + bias, 0.0)


if __name__ == "__main__":
    key = jax.random.PRNGKey(0)
    keys = jax.random.split(key, 8)

    # small synthetic batched graph: G=2 graphs, 64 nodes each
    G, n_per_graph = 2, 64
    N = G * n_per_graph
    in_feats, h_feats, num_classes, num_rels = 8, 32, 4, 3
    e_per_graph = 60

    src_list, dst_list = [], []
    for g in range(G):
        ks, kd = jax.random.split(keys[g], 2)
        src_list.append(jax.random.randint(ks, (e_per_graph,), 0, n_per_graph)
                        + g * n_per_graph)
        dst_list.append(jax.random.randint(kd, (e_per_graph,), 0, n_per_graph)
                        + g * n_per_graph)
    src = jnp.concatenate(src_list)
    dst = jnp.concatenate(dst_list)
    etypes = jax.random.randint(keys[2], (src.shape[0],), 0, num_rels)  # etypes.flatten()

    # dense per-relation adjacency (graph-structure glue for the dense kernels)
    A = jnp.zeros((num_rels, N, N), jnp.float32).at[etypes, dst, src].add(1.0)
    assert float(A.max()) <= 127.0, "int8 adjacency requires edge multiplicity <= 127"

    # mean_nodes readout matrix
    node_to_graph = jnp.repeat(jnp.arange(G), n_per_graph)
    M = (jnp.arange(G)[:, None] == node_to_graph[None, :]).astype(jnp.float32)
    M = M / float(n_per_graph)

    # node input features
    X = jax.random.normal(keys[3], (N, in_feats), jnp.float32)

    params1 = init_rel_graph_conv_params(keys[4], in_feats, h_feats, num_rels, num_rels)
    params2 = init_rel_graph_conv_params(keys[5], h_feats, num_classes, num_rels, num_rels)

    # pure-JAX (f32) reference
    h_ref = ref_layer(A, X, params1)
    h_ref = ref_layer(A, h_ref, params2)
    ref_out = M @ h_ref

    # path 1: VMEM-resident MSG (auto-selected for this size)
    out = jax.block_until_ready(rel_graph_conv_n_forward(A, M, X, params1, params2))
    np.testing.assert_allclose(np.asarray(out), np.asarray(ref_out),
                               rtol=5e-2, atol=2e-2)

    # path 2: src(contraction)-tiled streaming aggregation (large-graph / v7x path)
    out_s = jax.block_until_ready(
        rel_graph_conv_n_forward(A, M, X, params1, params2, force_mode="stream"))
    np.testing.assert_allclose(np.asarray(out_s), np.asarray(ref_out),
                               rtol=5e-2, atol=2e-2)

    assert out.shape == (G, num_classes)
    print("KERNEL_OK")
</pallas_src>

<mosaic_0001>
module attributes {stable_mosaic.version = 11 : i64} {
  func.func @_msg_kernel(%arg0: i32, %arg1: memref<128x8xbf16, #tpu.memory_space<vmem>>, %arg2: memref<4x8x128xbf16, #tpu.memory_space<vmem>>, %arg3: memref<4x128x128xbf16, #tpu.memory_space<vmem>>) attributes {dimension_semantics = [#tpu.dimension_semantics<parallel>], iteration_bounds = array<i64: 1>, scalar_prefetch = 0 : i64, scratch_operands = 0 : i64, tpu.core_type = #tpu.core_type<tc>, window_params = [{transform_indices = @transform_0, window_bounds = array<i64: 128, 8>}, {pipeline_mode = #tpu.pipeline_mode<synchronous>, transform_indices = @transform_1, window_bounds = array<i64: 4, 8, 128>}, {transform_indices = @transform_2, window_bounds = array<i64: 4, 128, 128>}]} {
    %c0 = arith.constant 0 : index
    %c0_0 = arith.constant 0 : index
    %0 = vector.load %arg1[%c0, %c0_0] : memref<128x8xbf16, #tpu.memory_space<vmem>>, vector<128x8xbf16>
    %c0_1 = arith.constant 0 : index
    %c0_2 = arith.constant 0 : index
    %c0_3 = arith.constant 0 : index
    %1 = vector.load %arg2[%c0_1, %c0_2, %c0_3] : memref<4x8x128xbf16, #tpu.memory_space<vmem>>, vector<1x8x128xbf16>
    %2 = vector.shape_cast %1 : vector<1x8x128xbf16> to vector<8x128xbf16>
    %cst = arith.constant dense<0.000000e+00> : vector<128x128xf32>
    %3 = tpu.matmul %0, %2, %cst {dimension_numbers = #tpu.dot_dimension_numbers<[1], [0], [0], [1], [0, 0, 1, 1], [], []>} : vector<128x8xbf16>, vector<8x128xbf16>, vector<128x128xf32> -> vector<128x128xf32>
    %4 = arith.truncf %3 : vector<128x128xf32> to vector<128x128xbf16>
    %c0_4 = arith.constant 0 : index
    %c0_5 = arith.constant 0 : index
    %c0_6 = arith.constant 0 : index
    %5 = vector.load %arg3[%c0_4, %c0_5, %c0_6] : memref<4x128x128xbf16, #tpu.memory_space<vmem>>, vector<1x128x128xbf16>
    %6 = vector.shape_cast %5 : vector<1x128x128xbf16> to vector<128x128xbf16>
    %7 = vector.shape_cast %4 : vector<128x128xbf16> to vector<1x128x128xbf16>
    tpu.vector_store %arg3[%c0_4, %c0_5, %c0_6], %7 {strides = array<i32>} : memref<4x128x128xbf16, #tpu.memory_space<vmem>>, vector<1x128x128xbf16>,
    %c1 = arith.constant 1 : index
    %c0_7 = arith.constant 0 : index
    %c0_8 = arith.constant 0 : index
    %8 = vector.load %arg2[%c1, %c0_7, %c0_8] : memref<4x8x128xbf16, #tpu.memory_space<vmem>>, vector<1x8x128xbf16>
    %9 = vector.shape_cast %8 : vector<1x8x128xbf16> to vector<8x128xbf16>
    %cst_9 = arith.constant dense<0.000000e+00> : vector<128x128xf32>
    %10 = tpu.matmul %0, %9, %cst_9 {dimension_numbers = #tpu.dot_dimension_numbers<[1], [0], [0], [1], [0, 0, 1, 1], [], []>} : vector<128x8xbf16>, vector<8x128xbf16>, vector<128x128xf32> -> vector<128x128xf32>
    %11 = arith.truncf %10 : vector<128x128xf32> to vector<128x128xbf16>
    %c1_10 = arith.constant 1 : index
    %c0_11 = arith.constant 0 : index
    %c0_12 = arith.constant 0 : index
    %12 = vector.load %arg3[%c1_10, %c0_11, %c0_12] : memref<4x128x128xbf16, #tpu.memory_space<vmem>>, vector<1x128x128xbf16>
    %13 = vector.shape_cast %12 : vector<1x128x128xbf16> to vector<128x128xbf16>
    %14 = vector.shape_cast %11 : vector<128x128xbf16> to vector<1x128x128xbf16>
    tpu.vector_store %arg3[%c1_10, %c0_11, %c0_12], %14 {strides = array<i32>} : memref<4x128x128xbf16, #tpu.memory_space<vmem>>, vector<1x128x128xbf16>,
    %c2 = arith.constant 2 : index
    %c0_13 = arith.constant 0 : index
    %c0_14 = arith.constant 0 : index
    %15 = vector.load %arg2[%c2, %c0_13, %c0_14] : memref<4x8x128xbf16, #tpu.memory_space<vmem>>, vector<1x8x128xbf16>
    %16 = vector.shape_cast %15 : vector<1x8x128xbf16> to vector<8x128xbf16>
    %cst_15 = arith.constant dense<0.000000e+00> : vector<128x128xf32>
    %17 = tpu.matmul %0, %16, %cst_15 {dimension_numbers = #tpu.dot_dimension_numbers<[1], [0], [0], [1], [0, 0, 1, 1], [], []>} : vector<128x8xbf16>, vector<8x128xbf16>, vector<128x128xf32> -> vector<128x128xf32>
    %18 = arith.truncf %17 : vector<128x128xf32> to vector<128x128xbf16>
    %c2_16 = arith.constant 2 : index
    %c0_17 = arith.constant 0 : index
    %c0_18 = arith.constant 0 : index
    %19 = vector.load %arg3[%c2_16, %c0_17, %c0_18] : memref<4x128x128xbf16, #tpu.memory_space<vmem>>, vector<1x128x128xbf16>
    %20 = vector.shape_cast %19 : vector<1x128x128xbf16> to vector<128x128xbf16>
    %21 = vector.shape_cast %18 : vector<128x128xbf16> to vector<1x128x128xbf16>
    tpu.vector_store %arg3[%c2_16, %c0_17, %c0_18], %21 {strides = array<i32>} : memref<4x128x128xbf16, #tpu.memory_space<vmem>>, vector<1x128x128xbf16>,
    %c3 = arith.constant 3 : index
    %c0_19 = arith.constant 0 : index
    %c0_20 = arith.constant 0 : index
    %22 = vector.load %arg2[%c3, %c0_19, %c0_20] : memref<4x8x128xbf16, #tpu.memory_space<vmem>>, vector<1x8x128xbf16>
    %23 = vector.shape_cast %22 : vector<1x8x128xbf16> to vector<8x128xbf16>
    %cst_21 = arith.constant dense<0.000000e+00> : vector<128x128xf32>
    %24 = tpu.matmul %0, %23, %cst_21 {dimension_numbers = #tpu.dot_dimension_numbers<[1], [0], [0], [1], [0, 0, 1, 1], [], []>} : vector<128x8xbf16>, vector<8x128xbf16>, vector<128x128xf32> -> vector<128x128xf32>
    %25 = arith.truncf %24 : vector<128x128xf32> to vector<128x128xbf16>
    %c3_22 = arith.constant 3 : index
    %c0_23 = arith.constant 0 : index
    %c0_24 = arith.constant 0 : index
    %26 = vector.load %arg3[%c3_22, %c0_23, %c0_24] : memref<4x128x128xbf16, #tpu.memory_space<vmem>>, vector<1x128x128xbf16>
    %27 = vector.shape_cast %26 : vector<1x128x128xbf16> to vector<128x128xbf16>
    %28 = vector.shape_cast %25 : vector<128x128xbf16> to vector<1x128x128xbf16>
    tpu.vector_store %arg3[%c3_22, %c0_23, %c0_24], %28 {strides = array<i32>} : memref<4x128x128xbf16, #tpu.memory_space<vmem>>, vector<1x128x128xbf16>,
    return
  }
  func.func @transform_0(%arg0: i32) -> (i32, i32) {
    %c0_i32 = arith.constant 0 : i32
    %c0_i32_0 = arith.constant 0 : i32
    return %arg0, %c0_i32 : i32, i32
  }
  func.func @transform_1(%arg0: i32) -> (i32, i32, i32) {
    %c0_i32 = arith.constant 0 : i32
    %c0_i32_0 = arith.constant 0 : i32
    %c0_i32_1 = arith.constant 0 : i32
    %c0_i32_2 = arith.constant 0 : i32
    return %c0_i32, %c0_i32_0, %c0_i32_1 : i32, i32, i32
  }
  func.func @transform_2(%arg0: i32) -> (i32, i32, i32) {
    %c0_i32 = arith.constant 0 : i32
    %c0_i32_0 = arith.constant 0 : i32
    %c0_i32_1 = arith.constant 0 : i32
    return %c0_i32, %arg0, %c0_i32_0 : i32, i32, i32
  }
}

</mosaic_0001>

<bundles_post_ra>
// kernel: tpu_custom_call.1
= control target key start
LH: loop header
LB: loop body
LE: loop exit
PB: predicated region body
PF: predicated region fallthrough
CT: control target
= control target key end

     0   :  { %vm95_vm0 = vcmask 1043456   ;;  %vm70_vm1 = vcmask 64512   ;;  %s1442_s0 = inlined_call_operand.vmem [shape: bf16[128,8], index: 0, kind: input, shape index: {}]   ;;  %s1443_s1 = inlined_call_operand.vmem [shape: bf16[4,8,128], index: 1, kind: input, shape index: {}]   ;;  %s1444_s2 = inlined_call_operand.hbm [shape: bf16[4,128,128], index: 2, kind: output, shape index: {}]  }
   0x1   :  { %v29_v0 = vld [vmem:[%s1443_s1] sm:$0xf]  ;;  %v873_v1 = vld [vmem:[%s1443_s1 + $0x4] sm:$0xf]  ;;  %v1316_v5 = vld [vmem:[%s1442_s0 + $0x8] sm:$0xff]  }
   0x2   :  { %v1315_v2 = vld [vmem:[%s1442_s0] sm:$0xff]   ;;  %1308 = vmatprep.subr.msk.bf16.mxu0 %vm95_vm0, %v29_v0  ;;  %1309 = vmatprep.subr.msk.bf16.mxu1 %vm95_vm0, %v873_v1  ;;  %v97_v3 = vsel %vm95_vm0, %v29_v0, 0  ;;  %v279_v4 = vsel %vm95_vm0, %v873_v1, 0  ;;  %v898_v6 = vld [vmem:[%s1443_s1 + $0x8] sm:$0xf]  ;;  %v1317_v10 = vld [vmem:[%s1442_s0 + $0x10] sm:$0xff]  }
   0x3   :  { %1237 = vmatpush3.bf16.msra.mxu0 %v97_v3  ;;  %1255 = vmatpush3.bf16.msra.mxu1 %v279_v4  ;;  %v923_v7 = vld [vmem:[%s1443_s1 + $0xc] sm:$0xf]  ;;  %v462_v8 = vsel %vm95_vm0, %v898_v6, 0  ;;  %v1318_v11 = vld [vmem:[%s1442_s0 + $0x18] sm:$0xff]  }
   0x4   :  { %1238 = vmatprep.mubr.msk.bf16.mxu0 %vm70_vm1, %v1315_v2  ;;  %1256 = vmatprep.mubr.msk.bf16.mxu1 %vm70_vm1, %v1315_v2  ;;  %v645_v9 = vsel %vm95_vm0, %v923_v7, 0 }
   0x5   :  { %1310 = vmatprep.subr.msk.bf16.mxu0 %vm95_vm0, %v898_v6  ;;  %1311 = vmatprep.subr.msk.bf16.mxu1 %vm95_vm0, %v923_v7 }
   0x6   :  { %1239 = vmatmul.mubr.msk.bf16.vlgmr.msra.gmra.mxu0 %vm70_vm1, %v1316_v5  ;;  %1257 = vmatmul.mubr.msk.bf16.vlgmr.msra.gmra.mxu1 %vm70_vm1, %v1316_v5 }
   0x7   :  { %1273 = vmatpush3.bf16.msra.mxu0 %v462_v8  ;;  %1291 = vmatpush3.bf16.msra.mxu1 %v645_v9 }
   0x8   :  { %1242 = vmatprep.mubr.msk.bf16.mxu0 %vm70_vm1, %v1317_v10  ;;  %1260 = vmatprep.mubr.msk.bf16.mxu1 %vm70_vm1, %v1317_v10 }
   0x9   :  { %7 = vsyncpa [#allocation3], 0  ;;  %v1319_v12 = vld [vmem:[%s1442_s0 + $0x20] sm:$0xff]   ;;  %v1320_v13 = vld [vmem:[%s1442_s0 + $0x28] sm:$0xff]  }
   0xa   :  { %v1321_v14 = vld [vmem:[%s1442_s0 + $0x30] sm:$0xff]   ;;  %v1322_v15 = vld [vmem:[%s1442_s0 + $0x38] sm:$0xff]   ;;  %s1345_s0 = smov [#allocation2]  }
   0xb   :  { %s830_s4 = sshll.u32 %s1345_s0, 4  ;;  %s831_s4 = int_to_ptr.vmem [resolvable:$true] %s830_s4 }
   0xc   :  { %s1323_s5 = scalar_lea.vmem %s831_s4, 4096  ;;  %p1328_p1 = scmp.lt.s32.totalorder %s831_s4, %s831_s4 }
   0xd   :  { %p1324_p0 = scmp.ne.s32.totalorder %s831_s4, %s1323_s5  ;;  %p1329_p2 = scmp.lt.s32.totalorder %s1323_s5, %s1323_s5 }
   0xe   :  { %1243 = vmatmul.mubr.msk.bf16.gmra.mxu0 %vm70_vm1, %v1318_v11  ;;  %1261 = vmatmul.mubr.msk.bf16.gmra.mxu1 %vm70_vm1, %v1318_v11 }
   0xf   :  { %1246 = vmatprep.mubr.msk.bf16.mxu0 %vm70_vm1, %v1319_v12  ;;  %1264 = vmatprep.mubr.msk.bf16.mxu1 %vm70_vm1, %v1319_v12  ;;  %p1330_p3 = por %p1329_p2, %p1328_p1 }
  0x11   :  { %p1331_p4 = pnand %p1330_p3, %p1324_p0 }
  0x16   :  { %1247 = vmatmul.mubr.msk.bf16.gmra.mxu0 %vm70_vm1, %v1320_v13  ;;  %1265 = vmatmul.mubr.msk.bf16.gmra.mxu1 %vm70_vm1, %v1320_v13 }
  0x17   :  { %1250 = vmatprep.mubr.msk.bf16.mxu0 %vm70_vm1, %v1321_v14  ;;  %1268 = vmatprep.mubr.msk.bf16.mxu1 %vm70_vm1, %v1321_v14 }
  0x1e   :  { %1251 = vmatmul.mubr.msk.bf16.gmra.mxu0 %vm70_vm1, %v1322_v15  ;;  %1269 = vmatmul.mubr.msk.bf16.gmra.mxu1 %vm70_vm1, %v1322_v15 }
  0x1f   :  { %1274 = vmatprep.mubr.msk.bf16.mxu0 %vm70_vm1, %v1315_v2  ;;  %1292 = vmatprep.mubr.msk.bf16.mxu1 %vm70_vm1, %v1315_v2 }
  0x26   :  { %1275 = vmatmul.mubr.msk.bf16.vlgmr.msra.gmra.mxu0 %vm70_vm1, %v1316_v5  ;;  %1293 = vmatmul.mubr.msk.bf16.vlgmr.msra.gmra.mxu1 %vm70_vm1, %v1316_v5 }
  0x27   :  { %1278 = vmatprep.mubr.msk.bf16.mxu0 %vm70_vm1, %v1317_v10  ;;  %1296 = vmatprep.mubr.msk.bf16.mxu1 %vm70_vm1, %v1317_v10 }
  0x2e   :  { %1279 = vmatmul.mubr.msk.bf16.gmra.mxu0 %vm70_vm1, %v1318_v11  ;;  %1297 = vmatmul.mubr.msk.bf16.gmra.mxu1 %vm70_vm1, %v1318_v11 }
  0x2f   :  { %1282 = vmatprep.mubr.msk.bf16.mxu0 %vm70_vm1, %v1319_v12  ;;  %1300 = vmatprep.mubr.msk.bf16.mxu1 %vm70_vm1, %v1319_v12 }
  0x36   :  { %1283 = vmatmul.mubr.msk.bf16.gmra.mxu0 %vm70_vm1, %v1320_v13  ;;  %1301 = vmatmul.mubr.msk.bf16.gmra.mxu1 %vm70_vm1, %v1320_v13 }
  0x37   :  { %1286 = vmatprep.mubr.msk.bf16.mxu0 %vm70_vm1, %v1321_v14  ;;  %1304 = vmatprep.mubr.msk.bf16.mxu1 %vm70_vm1, %v1321_v14 }
  0x3e   :  { %1287 = vmatmul.mubr.msk.bf16.gmra.mxu0 %vm70_vm1, %v1322_v15  ;;  %1305 = vmatmul.mubr.msk.bf16.gmra.mxu1 %vm70_vm1, %v1322_v15 }
  0xc6   :  { %v1240_v16 = vpop.f32.mrf.mxu0  ;;  %v1258_v17 = vpop.f32.mrf.mxu1 }
  0xc8   :  { %v133_v18 = vpop.f32.mrf.mxu0  ;;  %v315_v19 = vpop.f32.mrf.mxu1 }
  0xca   :  { %v1241_v20 = vpop.f32.mrf.mxu0  ;;  %v1259_v21 = vpop.f32.mrf.mxu1 }
  0xcb   :  { %v1020_v22 = vpack.c.bf16 %v1241_v20, %v1240_v16  ;;  %v1060_v23 = vpack.c.bf16 %v1259_v21, %v1258_v17 }
  0xcc   :  { %v136_v24 = vpop.f32.mrf.mxu0  ;;  %v318_v25 = vpop.f32.mrf.mxu1 }
  0xcd   :  { %1172 = vst [vmem:[#allocation2 + $0x8] sm:$0xff] %v1020_v22   ;;  %1179 = vst [vmem:[#allocation2 + $0x48] sm:$0xff] %v1060_v23   ;;  %v1015_v26 = vpack.c.bf16 %v136_v24, %v133_v18  ;;  %v1055_v27 = vpack.c.bf16 %v318_v25, %v315_v19 }
  0xce   :  { %v1244_v28 = vpop.f32.mrf.mxu0  ;;  %v1262_v29 = vpop.f32.mrf.mxu1 }
  0xcf   :  { %1016 = vst [vmem:[#allocation2] sm:$0xff] %v1015_v26   ;;  %1056 = vst [vmem:[#allocation2 + $0x40] sm:$0xff] %v1055_v27  }
  0xd0   :  { %v149_v30 = vpop.f32.mrf.mxu0  ;;  %v331_v31 = vpop.f32.mrf.mxu1 }
  0xd2   :  { %v1245_v32 = vpop.f32.mrf.mxu0  ;;  %v1263_v33 = vpop.f32.mrf.mxu1 }
  0xd3   :  { %v1030_v34 = vpack.c.bf16 %v1245_v32, %v1244_v28  ;;  %v1070_v35 = vpack.c.bf16 %v1263_v33, %v1262_v29 }
  0xd4   :  { %v152_v36 = vpop.f32.mrf.mxu0  ;;  %v334_v37 = vpop.f32.mrf.mxu1 }
  0xd5   :  { %1174 = vst [vmem:[#allocation2 + $0x18] sm:$0xff] %v1030_v34   ;;  %1181 = vst [vmem:[#allocation2 + $0x58] sm:$0xff] %v1070_v35   ;;  %v1025_v38 = vpack.c.bf16 %v152_v36, %v149_v30  ;;  %v1065_v39 = vpack.c.bf16 %v334_v37, %v331_v31 }
  0xd6   :  { %v1248_v40 = vpop.f32.mrf.mxu0  ;;  %v1266_v41 = vpop.f32.mrf.mxu1 }
  0xd7   :  { %1173 = vst [vmem:[#allocation2 + $0x10] sm:$0xff] %v1025_v38   ;;  %1180 = vst [vmem:[#allocation2 + $0x50] sm:$0xff] %v1065_v39  }
  0xd8   :  { %v165_v42 = vpop.f32.mrf.mxu0  ;;  %v347_v43 = vpop.f32.mrf.mxu1 }
  0xda   :  { %v1249_v44 = vpop.f32.mrf.mxu0  ;;  %v1267_v45 = vpop.f32.mrf.mxu1 }
  0xdb   :  { %v1040_v46 = vpack.c.bf16 %v1249_v44, %v1248_v40  ;;  %v1080_v47 = vpack.c.bf16 %v1267_v45, %v1266_v41 }
  0xdc   :  { %v168_v48 = vpop.f32.mrf.mxu0  ;;  %v350_v49 = vpop.f32.mrf.mxu1 }
  0xdd   :  { %1176 = vst [vmem:[#allocation2 + $0x28] sm:$0xff] %v1040_v46   ;;  %1183 = vst [vmem:[#allocation2 + $0x68] sm:$0xff] %v1080_v47   ;;  %v1035_v50 = vpack.c.bf16 %v168_v48, %v165_v42  ;;  %v1075_v51 = vpack.c.bf16 %v350_v49, %v347_v43 }
  0xde   :  { %v1252_v52 = vpop.f32.mrf.mxu0  ;;  %v1270_v53 = vpop.f32.mrf.mxu1 }
  0xdf   :  { %1175 = vst [vmem:[#allocation2 + $0x20] sm:$0xff] %v1035_v50   ;;  %1182 = vst [vmem:[#allocation2 + $0x60] sm:$0xff] %v1075_v51  }
  0xe0   :  { %v181_v54 = vpop.f32.mrf.mxu0  ;;  %v363_v55 = vpop.f32.mrf.mxu1 }
  0xe2   :  { %v1253_v56 = vpop.f32.mrf.mxu0  ;;  %v1271_v57 = vpop.f32.mrf.mxu1 }
  0xe3   :  { %v1050_v58 = vpack.c.bf16 %v1253_v56, %v1252_v52  ;;  %v1090_v59 = vpack.c.bf16 %v1271_v57, %v1270_v53 }
  0xe4   :  { %v184_v60 = vpop.f32.mrf.mxu0  ;;  %v366_v61 = vpop.f32.mrf.mxu1 }
  0xe5   :  { %1178 = vst [vmem:[#allocation2 + $0x38] sm:$0xff] %v1050_v58   ;;  %1185 = vst [vmem:[#allocation2 + $0x78] sm:$0xff] %v1090_v59   ;;  %v1045_v62 = vpack.c.bf16 %v184_v60, %v181_v54  ;;  %v1085_v63 = vpack.c.bf16 %v366_v61, %v363_v55 }
  0xe6   :  { %v1276_v0 = vpop.f32.mrf.mxu0  ;;  %v1294_v1 = vpop.f32.mrf.mxu1 }
  0xe7   :  { %1177 = vst [vmem:[#allocation2 + $0x30] sm:$0xff] %v1045_v62   ;;  %1184 = vst [vmem:[#allocation2 + $0x70] sm:$0xff] %v1085_v63  }
  0xe8   :  { %v498_v2 = vpop.f32.mrf.mxu0  ;;  %v681_v3 = vpop.f32.mrf.mxu1 }
  0xea   :  { %v1277_v4 = vpop.f32.mrf.mxu0  ;;  %v1295_v5 = vpop.f32.mrf.mxu1 }
  0xeb   :  { %v1100_v6 = vpack.c.bf16 %v1277_v4, %v1276_v0  ;;  %v1140_v7 = vpack.c.bf16 %v1295_v5, %v1294_v1 }
  0xec   :  { %v501_v8 = vpop.f32.mrf.mxu0  ;;  %v684_v9 = vpop.f32.mrf.mxu1 }
  0xed   :  { %1186 = vst [vmem:[#allocation2 + $0x88] sm:$0xff] %v1100_v6   ;;  %1193 = vst [vmem:[#allocation2 + $0xc8] sm:$0xff] %v1140_v7   ;;  %v1095_v10 = vpack.c.bf16 %v501_v8, %v498_v2  ;;  %v1135_v11 = vpack.c.bf16 %v684_v9, %v681_v3 }
  0xee   :  { %v1280_v12 = vpop.f32.mrf.mxu0  ;;  %v1298_v13 = vpop.f32.mrf.mxu1 }
  0xef   :  { %1096 = vst [vmem:[#allocation2 + $0x80] sm:$0xff] %v1095_v10   ;;  %1136 = vst [vmem:[#allocation2 + $0xc0] sm:$0xff] %v1135_v11  }
  0xf0   :  { %v514_v14 = vpop.f32.mrf.mxu0  ;;  %v697_v15 = vpop.f32.mrf.mxu1 }
  0xf2   :  { %v1281_v16 = vpop.f32.mrf.mxu0  ;;  %v1299_v17 = vpop.f32.mrf.mxu1 }
  0xf3   :  { %v1110_v18 = vpack.c.bf16 %v1281_v16, %v1280_v12  ;;  %v1150_v19 = vpack.c.bf16 %v1299_v17, %v1298_v13 }
  0xf4   :  { %v517_v20 = vpop.f32.mrf.mxu0  ;;  %v700_v21 = vpop.f32.mrf.mxu1 }
  0xf5   :  { %1188 = vst [vmem:[#allocation2 + $0x98] sm:$0xff] %v1110_v18   ;;  %1195 = vst [vmem:[#allocation2 + $0xd8] sm:$0xff] %v1150_v19   ;;  %v1105_v22 = vpack.c.bf16 %v517_v20, %v514_v14  ;;  %v1145_v23 = vpack.c.bf16 %v700_v21, %v697_v15 }
  0xf6   :  { %v1284_v24 = vpop.f32.mrf.mxu0  ;;  %v1302_v25 = vpop.f32.mrf.mxu1 }
  0xf7   :  { %1187 = vst [vmem:[#allocation2 + $0x90] sm:$0xff] %v1105_v22   ;;  %1194 = vst [vmem:[#allocation2 + $0xd0] sm:$0xff] %v1145_v23  }
  0xf8   :  { %v530_v26 = vpop.f32.mrf.mxu0  ;;  %v713_v27 = vpop.f32.mrf.mxu1 }
  0xfa   :  { %v1285_v28 = vpop.f32.mrf.mxu0  ;;  %v1303_v29 = vpop.f32.mrf.mxu1 }
  0xfb   :  { %v1120_v30 = vpack.c.bf16 %v1285_v28, %v1284_v24  ;;  %v1160_v31 = vpack.c.bf16 %v1303_v29, %v1302_v25 }
  0xfc   :  { %v533_v32 = vpop.f32.mrf.mxu0  ;;  %v716_v33 = vpop.f32.mrf.mxu1 }
  0xfd   :  { %1190 = vst [vmem:[#allocation2 + $0xa8] sm:$0xff] %v1120_v30   ;;  %1197 = vst [vmem:[#allocation2 + $0xe8] sm:$0xff] %v1160_v31   ;;  %v1115_v34 = vpack.c.bf16 %v533_v32, %v530_v26  ;;  %v1155_v35 = vpack.c.bf16 %v716_v33, %v713_v27 }
  0xfe   :  { %v1288_v36 = vpop.f32.mrf.mxu0  ;;  %v1306_v37 = vpop.f32.mrf.mxu1 }
  0xff   :  { %1189 = vst [vmem:[#allocation2 + $0xa0] sm:$0xff] %v1115_v34   ;;  %1196 = vst [vmem:[#allocation2 + $0xe0] sm:$0xff] %v1155_v35  }
 0x100   :  { %v546_v38 = vpop.f32.mrf.mxu0  ;;  %v729_v39 = vpop.f32.mrf.mxu1 }
 0x102   :  { %v1289_v40 = vpop.f32.mrf.mxu0  ;;  %v1307_v41 = vpop.f32.mrf.mxu1 }
 0x103   :  { %v1130_v42 = vpack.c.bf16 %v1289_v40, %v1288_v36  ;;  %v1170_v43 = vpack.c.bf16 %v1307_v41, %v1306_v37 }
 0x104   :  { %v549_v44 = vpop.f32.mrf.mxu0  ;;  %v732_v45 = vpop.f32.mrf.mxu1 }
 0x105   :  { %1192 = vst [vmem:[#allocation2 + $0xb8] sm:$0xff] %v1130_v42   ;;  %1199 = vst [vmem:[#allocation2 + $0xf8] sm:$0xff] %v1170_v43   ;;  %v1125_v46 = vpack.c.bf16 %v549_v44, %v546_v38  ;;  %v1165_v47 = vpack.c.bf16 %v732_v45, %v729_v39 }
 0x107   :  { %1191 = vst [vmem:[#allocation2 + $0xb0] sm:$0xff] %v1125_v46   ;;  %1198 = vst [vmem:[#allocation2 + $0xf0] sm:$0xff] %v1165_v47  }
 0x108   :  { %1334 = shalt.err (!%p1331_p4)
}
 0x109   :  { %s1346_s6 = smov 64   ;;  %s1347_s7 = smov 4  }
 0x10a   :  { %836 = dma.vmem_to_hbm [thread:$0]  %s831_s4, 4096, %s1444_s2, [#allocation3], %s1346_s6, %s1346_s6, %s1347_s7  }
 0x10b   :  { %1343 = dma.done.wait [#allocation3], 4096  }
 0x10c   :  { %1344 = vsyncadd [#allocation3], 4294963200 }
 0x10d   :  { %840 = vsyncpa [#allocation3], 1 }

</bundles_post_ra>
